<compile_context>
chip_gen: v7x
topology: tpu7x:2x2x1
jax: 0.10.0
libtpu: 0.0.40
codegen_flags: <defaults>
</compile_context>

<pallas_src>
import jax
import jax.numpy as jnp
from jax import lax
from jax.experimental import pallas as pl
from jax.experimental.pallas import tpu as pltpu

K = 32                # Conv1d kernel size == stride
PACK = 4              # conv windows packed per 128-lane row
LANES = K * PACK      # 128

_TB_HARD_CAP = 1024           # max batch rows per tile (review: 512-1024)
_X_BLOCK_TARGET = 8 << 20     # ~8 MiB x tile: amortizes per-step overhead
_TG_ABS_CAP = 1024            # bounds the static per-block group unroll
_OUT_BLOCK_BUDGET = 16 << 20  # cap for 2x output-tile VMEM when out_dim is huge


def _cdiv(a, b):
    return -(-a // b)


def _round_up(x, m):
    return _cdiv(x, m) * m


def _make_router_kernel(tg, nt_h, tk, needs_mask):
    """tg: 128-lane groups per x block; nt_h: time blocks per split half;
    tk: number of valid elements along L; needs_mask: any ragged/clamped block."""

    def kernel(x_ref, w_ref, o_ref, acc_ref):
        # x_ref  : (TB, tg*128) f32  -- raw x slab (tail may contain garbage)
        # w_ref  : (128, OUT_pad) f32 -- conv weight tiled 4x along lanes (resident)
        # o_ref  : (1, TB, OUT_pad) f32 -- per-split partial output slab
        # acc_ref: (TB, 128) f32 -- persistent VMEM accumulator
        h = pl.program_id(0)
        t = pl.program_id(2)

        @pl.when(t == 0)
        def _init():
            acc_ref[...] = jnp.zeros_like(acc_ref)

        # True (unclamped) global time-block index.  The x index_map clamps the
        # DMA to a valid block; the mask below uses the unclamped position so
        # clamped duplicate blocks and the ragged tail contribute exactly 0.
        t_global = h * nt_h + t
        rem = tk - t_global * (tg * LANES)   # valid elements left at block start
        if needs_mask:
            lane = lax.broadcasted_iota(jnp.int32, acc_ref.shape, 1)

        total = None
        for g in range(tg):                  # static unroll; tg is bounded
            slab = x_ref[:, pl.ds(g * LANES, LANES)]
            if needs_mask:
                # select (not multiply): garbage in padded regions may be NaN.
                slab = jnp.where(lane < rem - g * LANES, slab, 0.0)
            total = slab if total is None else total + slab
        acc_ref[...] += total

        @pl.when(t == pl.num_programs(2) - 1)
        def _finalize():
            o_ref[0] = jnp.dot(
                acc_ref[...], w_ref[...], preferred_element_type=jnp.float32
            ).astype(o_ref.dtype)

    return kernel


def prepare_router_weight(weight, out_pad=None):
    """(out_dim, 1, 32) Conv1d weight -> lane-dense (128, out_pad) tile.

    Compute once and cache alongside the params (row l == weight[:, 0, l % 32]).
    """
    out_dim = weight.shape[0]
    if out_pad is None:
        out_pad = _round_up(out_dim, 128)
    w = jnp.transpose(weight.reshape(out_dim, K))         # (32, out_dim)
    w = jnp.pad(w, ((0, 0), (0, out_pad - out_dim)))      # (32, OUT_pad)
    return jnp.tile(w, (PACK, 1))                         # (128, OUT_pad)


def router_forward(x, weight, *, max_x_block_bytes=_X_BLOCK_TARGET):
    """Eval-mode Router forward.

    x      : (B, L) float32
    weight : (out_dim, 1, 32) float32 (PyTorch Conv1d weight layout)
    returns: (B, out_dim) float32
    """
    assert x.ndim == 2, "x must be (batch, input_dim)"
    B, L = x.shape
    out_dim = weight.shape[0]

    T = L // K                 # PyTorch Conv1d drops the trailing partial window
    if T == 0:
        return jnp.zeros((B, out_dim), x.dtype)
    TK = T * K                 # valid elements along the L axis
    G = _cdiv(TK, LANES)       # 128-lane groups covering the valid range
    OUT_pad = _round_up(out_dim, 128)

    # ---- tile selection ------------------------------------------------------
    out_tb_cap = max(8, ((_OUT_BLOCK_BUDGET // (OUT_pad * 4 * 2)) // 8) * 8)
    tb_cap = min(_TB_HARD_CAP, out_tb_cap)
    TB = B if B <= tb_cap else tb_cap       # TB == B uses the full-dim exception
    nb = _cdiv(B, TB)

    tg_cap = max(1, min(max_x_block_bytes // (TB * LANES * 4), _TG_ABS_CAP))
    TG = min(G, tg_cap)
    nt = _cdiv(G, TG)                       # time blocks covering the valid range

    # v7x has 2 TensorCores: if the batch axis has only one tile, split the
    # reduction into two parallel halves; partial outputs are summed in the
    # wrapper (the matmul is linear, so this is exact).
    nsplit = 2 if (nb == 1 and nt >= 2) else 1
    nt_h = _cdiv(nt, nsplit)

    # Masking is only required if some block is clamped or overruns TK.
    needs_mask = (nsplit * nt_h != nt) or (nt * TG * LANES != TK)

    w_rep = prepare_router_weight(weight, OUT_pad)

    # Explicit VMEM budget: 2x double-buffered x block + 2x weight + 2x output
    # block + accumulator + slack.  Stays well under v7x's 64 MiB per-core VMEM.
    x_block_bytes = TB * TG * LANES * 4
    vmem_limit = (2 * x_block_bytes
                  + 2 * LANES * OUT_pad * 4
                  + 2 * TB * OUT_pad * 4
                  + TB * LANES * 4
                  + (4 << 20))

    kernel = _make_router_kernel(TG, nt_h, TK, needs_mask)

    out = pl.pallas_call(
        kernel,
        out_shape=jax.ShapeDtypeStruct((nsplit, B, OUT_pad), jnp.float32),
        grid_spec=pltpu.PrefetchScalarGridSpec(
            num_scalar_prefetch=0,
            grid=(nsplit, nb, nt_h),        # reduction (time) axis last
            in_specs=[
                # Raw, un-padded x: clamp the time-block index; any garbage in
                # ragged/clamped blocks is masked inside the kernel.
                pl.BlockSpec(
                    (TB, TG * LANES),
                    lambda h, i, t: (i, jnp.minimum(h * nt_h + t, nt - 1)),
                ),
                # Resident lane-dense weight (constant block index -> one DMA).
                pl.BlockSpec((LANES, OUT_pad), lambda h, i, t: (0, 0)),
            ],
            out_specs=pl.BlockSpec((1, TB, OUT_pad), lambda h, i, t: (h, i, 0)),
            scratch_shapes=[pltpu.VMEM((TB, LANES), jnp.float32)],
        ),
        compiler_params=pltpu.CompilerParams(
            dimension_semantics=("parallel", "parallel", "arbitrary"),
            vmem_limit_bytes=int(vmem_limit),
        ),
        cost_estimate=pl.CostEstimate(
            flops=B * TK + 2 * B * LANES * out_dim,
            transcendentals=0,
            bytes_accessed=4 * (B * TK + LANES * OUT_pad + nsplit * B * OUT_pad),
        ),
    )(x, w_rep)

    result = out.sum(axis=0) if nsplit > 1 else out[0]
    # TODO(synk): training-mode branch adds torch.rand noise on CUDA; only the
    # deterministic eval-mode semantics are implemented here.
    return result[:, :out_dim]


def router_reference(x, weight):
    """Pure-JAX reference of the same math (conv1d stride==kernel, then sum)."""
    B, L = x.shape
    out_dim = weight.shape[0]
    T = L // K
    xw = x[:, : T * K].reshape(B, T, K)
    w = weight.reshape(out_dim, K)
    return jnp.einsum("btk,ok->bo", xw, w)


if __name__ == "__main__":
    key = jax.random.PRNGKey(0)
    k_x1, k_x2, k_w = jax.random.split(key, 3)

    # Small shapes consistent with the module: x is (batch, input_dim).
    B, L, out_dim = 2, 128, 8
    x = jax.random.normal(k_x1, (B, L), dtype=jnp.float32)

    # Module-faithful weight: reset_parameters() zeroes the Conv1d weight.
    weight_zero = jnp.zeros((out_dim, 1, K), dtype=jnp.float32)
    y0 = router_forward(x, weight_zero)
    jax.block_until_ready(y0)
    assert y0.shape == (B, out_dim)
    assert jnp.allclose(y0, jnp.zeros((B, out_dim), jnp.float32))

    # Kernel math vs pure-JAX reference with a nonzero (deterministic) weight.
    weight_test = jax.random.normal(k_w, (out_dim, 1, K), dtype=jnp.float32)
    y_k = router_forward(x, weight_test)
    y_r = router_reference(x, weight_test)
    jax.block_until_ready((y_k, y_r))
    assert jnp.allclose(y_k, y_r, atol=1e-2, rtol=1e-3)

    # Ragged / multi-block path: L = 1100 -> 34 windows (4 trailing elements
    # dropped), 9 lane-groups (odd), tiny block cap forces many time blocks,
    # the 2-way reduction split, the clamped index_map and in-kernel masking.
    B2, L2 = 5, 1100
    x2 = jax.random.normal(k_x2, (B2, L2), dtype=jnp.float32)
    y_k2 = router_forward(x2, weight_test, max_x_block_bytes=2048)
    y_r2 = router_reference(x2, weight_test)
    jax.block_until_ready((y_k2, y_r2))
    assert jnp.allclose(y_k2, y_r2, atol=1e-2, rtol=1e-3)

    print("KERNEL_OK")
</pallas_src>

<mosaic_0001>
module attributes {stable_mosaic.version = 11 : i64} {
  func.func @kernel(%arg0: i32, %arg1: i32, %arg2: i32, %arg3: memref<2x128xf32, #tpu.memory_space<vmem>>, %arg4: memref<128x128xf32, #tpu.memory_space<vmem>>, %arg5: memref<1x2x128xf32, #tpu.memory_space<vmem>>, %arg6: memref<2x128xf32, #tpu.memory_space<vmem>>) attributes {dimension_semantics = [#tpu.dimension_semantics<parallel>, #tpu.dimension_semantics<parallel>, #tpu.dimension_semantics<arbitrary>], iteration_bounds = array<i64: 1, 1, 1>, scalar_prefetch = 0 : i64, scratch_operands = 1 : i64, tpu.core_type = #tpu.core_type<tc>, window_params = [{transform_indices = @transform_0, window_bounds = array<i64: 2, 128>}, {pipeline_mode = #tpu.pipeline_mode<synchronous>, transform_indices = @transform_1, window_bounds = array<i64: 128, 128>}, {transform_indices = @transform_2, window_bounds = array<i64: 1, 2, 128>}]} {
    %c0_i32 = arith.constant 0 : i32
    %0 = arith.cmpi eq, %arg2, %c0_i32 : i32
    %1 = arith.extui %0 : i1 to i32
    %c0_i32_0 = arith.constant 0 : i32
    %2 = arith.cmpi ne, %1, %c0_i32_0 : i32
    scf.if %2 {
      %cst = arith.constant 0.000000e+00 : f32
      %10 = vector.broadcast %cst : f32 to vector<2x128xf32>
      %c0_8 = arith.constant 0 : index
      %c0_9 = arith.constant 0 : index
      %11 = vector.load %arg6[%c0_8, %c0_9] : memref<2x128xf32, #tpu.memory_space<vmem>>, vector<2x128xf32>
      tpu.vector_store %arg6[%c0_8, %c0_9], %10 {strides = array<i32>} : memref<2x128xf32, #tpu.memory_space<vmem>>, vector<2x128xf32>,
    } else {
    }
    %c0 = arith.constant 0 : index
    %c0_1 = arith.constant 0 : index
    %3 = vector.load %arg3[%c0, %c0_1] : memref<2x128xf32, #tpu.memory_space<vmem>>, vector<2x128xf32>
    %c0_2 = arith.constant 0 : index
    %c0_3 = arith.constant 0 : index
    %4 = vector.load %arg6[%c0_2, %c0_3] : memref<2x128xf32, #tpu.memory_space<vmem>>, vector<2x128xf32>
    %5 = arith.addf %4, %3 : vector<2x128xf32>
    %c0_4 = arith.constant 0 : index
    %c0_5 = arith.constant 0 : index
    %6 = vector.load %arg6[%c0_4, %c0_5] : memref<2x128xf32, #tpu.memory_space<vmem>>, vector<2x128xf32>
    tpu.vector_store %arg6[%c0_4, %c0_5], %5 {strides = array<i32>} : memref<2x128xf32, #tpu.memory_space<vmem>>, vector<2x128xf32>,
    %c0_i32_6 = arith.constant 0 : i32
    %7 = arith.cmpi eq, %arg2, %c0_i32_6 : i32
    %8 = arith.extui %7 : i1 to i32
    %c0_i32_7 = arith.constant 0 : i32
    %9 = arith.cmpi ne, %8, %c0_i32_7 : i32
    scf.if %9 {
      %c0_8 = arith.constant 0 : index
      %c0_9 = arith.constant 0 : index
      %10 = vector.load %arg6[%c0_8, %c0_9] : memref<2x128xf32, #tpu.memory_space<vmem>>, vector<2x128xf32>
      %c0_10 = arith.constant 0 : index
      %c0_11 = arith.constant 0 : index
      %11 = vector.load %arg4[%c0_10, %c0_11] : memref<128x128xf32, #tpu.memory_space<vmem>>, vector<128x128xf32>
      %cst = arith.constant dense<0.000000e+00> : vector<2x128xf32>
      %12 = tpu.matmul %10, %11, %cst {dimension_numbers = #tpu.dot_dimension_numbers<[1], [0], [0], [1], [0, 0, 1, 1], [], []>} : vector<2x128xf32>, vector<128x128xf32>, vector<2x128xf32> -> vector<2x128xf32>
      %c0_12 = arith.constant 0 : index
      %c0_13 = arith.constant 0 : index
      %c0_14 = arith.constant 0 : index
      %13 = vector.load %arg5[%c0_12, %c0_13, %c0_14] : memref<1x2x128xf32, #tpu.memory_space<vmem>>, vector<1x2x128xf32>
      %14 = vector.shape_cast %13 : vector<1x2x128xf32> to vector<2x128xf32>
      %15 = vector.shape_cast %12 : vector<2x128xf32> to vector<1x2x128xf32>
      tpu.vector_store %arg5[%c0_12, %c0_13, %c0_14], %15 {strides = array<i32>} : memref<1x2x128xf32, #tpu.memory_space<vmem>>, vector<1x2x128xf32>,
    } else {
    }
    return
  }
  func.func @transform_0(%arg0: i32, %arg1: i32, %arg2: i32) -> (i32, i32) {
    %c1_i32 = arith.constant 1 : i32
    %0 = arith.muli %arg0, %c1_i32 : i32
    %1 = arith.addi %0, %arg2 : i32
    %c0_i32 = arith.constant 0 : i32
    %2 = arith.minsi %1, %c0_i32 : i32
    %c0_i32_0 = arith.constant 0 : i32
    return %arg1, %2 : i32, i32
  }
  func.func @transform_1(%arg0: i32, %arg1: i32, %arg2: i32) -> (i32, i32) {
    %c0_i32 = arith.constant 0 : i32
    %c0_i32_0 = arith.constant 0 : i32
    %c0_i32_1 = arith.constant 0 : i32
    return %c0_i32, %c0_i32_0 : i32, i32
  }
  func.func @transform_2(%arg0: i32, %arg1: i32, %arg2: i32) -> (i32, i32, i32) {
    %c0_i32 = arith.constant 0 : i32
    %c0_i32_0 = arith.constant 0 : i32
    return %arg0, %arg1, %c0_i32 : i32, i32, i32
  }
}

</mosaic_0001>

<bundles_post_ra>
// kernel: tpu_custom_call.1
= control target key start
LH: loop header
LB: loop body
LE: loop exit
PB: predicated region body
PF: predicated region fallthrough
CT: control target
= control target key end

     0   :  { %7 = vsyncpa [#allocation4], 0  ;;  %s386_s0 = inlined_call_operand.hbm [shape: f32[2,128], index: 0, kind: input, shape index: {}]   ;;  %s387_s1 = inlined_call_operand.hbm [shape: f32[128,128], index: 1, kind: input, shape index: {}]   ;;  %s388_s2 = inlined_call_operand.hbm [shape: f32[1,2,128], index: 2, kind: output, shape index: {}]  }
   0x1   :  { %8 = vsyncpa [#allocation7], 0 }
   0x2   :  { %9 = vsyncpa [#allocation5], 0  ;;  %s320_s9 = smov [#allocation3]   ;;  %s321_s11 = smov [#allocation6]  }
   0x3   :  { %s21_s10 = sshll.u32 %s320_s9, 4  ;;  %s30_s12 = sshll.u32 %s321_s11, 4  ;;  %s22_s10 = int_to_ptr.vmem [resolvable:$true] %s21_s10  ;;  %s343_s12 = int_to_ptr.vmem [resolvable:$true] %s30_s12 }
   0x4   :  { %s248_s15 = scalar_lea.hbm %s386_s0, 32 }
   0x5   :  { %p249_p0 = scmp.ne.s32.totalorder %s386_s0, %s248_s15  ;;  %p252_p1 = scmp.lt.u32.totalorder %s248_s15, %s386_s0 }
   0x7   :  { %p254_p2 = pnand %p252_p1, %p249_p0 }
   0x9   :  { %257 = shalt.err (!%p254_p2)
}
   0xa   :  { %s258_s20 = scalar_lea.vmem %s22_s10, 32  ;;  %p263_p4 = scmp.lt.s32.totalorder %s22_s10, %s22_s10 }
   0xb   :  { %p259_p3 = scmp.ne.s32.totalorder %s22_s10, %s258_s20  ;;  %p264_p5 = scmp.lt.s32.totalorder %s258_s20, %s258_s20 }
   0xd   :  { %p265_p6 = por %p264_p5, %p263_p4 }
   0xf   :  { %p266_p7 = pnand %p265_p6, %p259_p3 }
  0x11   :  { %269 = shalt.err (!%p266_p7)
}
  0x12   :  { %24 = dma.hbm_to_vmem [thread:$0]  %s386_s0, 32, %s22_s10, [#allocation4]  }
  0x13   :  { %s270_s25 = scalar_lea.hbm %s387_s1, 2048 }
  0x14   :  { %p271_p8 = scmp.ne.s32.totalorder %s387_s1, %s270_s25  ;;  %p274_p9 = scmp.lt.u32.totalorder %s270_s25, %s387_s1 }
  0x16   :  { %p276_p10 = pnand %p274_p9, %p271_p8 }
  0x18   :  { %279 = shalt.err (!%p276_p10)
}
  0x19   :  { %s280_s30 = scalar_lea.vmem %s343_s12, 2048  ;;  %p285_p12 = scmp.lt.s32.totalorder %s343_s12, %s343_s12 }
  0x1a   :  { %p281_p11 = scmp.ne.s32.totalorder %s343_s12, %s280_s30  ;;  %p286_p13 = scmp.lt.s32.totalorder %s280_s30, %s280_s30 }
  0x1c   :  { %p287_p0 = por %p286_p13, %p285_p12 }
  0x1e   :  { %p288_p1 = pnand %p287_p0, %p281_p11 }
  0x20   :  { %291 = shalt.err (!%p288_p1)
}
  0x21   :  { %s322_s0 = smov 128   ;;  %s323_s3 = smov 8  }
  0x22   :  { %36 = dma.hbm_to_vmem [thread:$0]  %s387_s1, 2048, %s343_s12, [#allocation7], %s322_s0, %s322_s0, %s323_s3  }
  0x23   :  { %314 = dma.done.wait [#allocation4], 32  }
  0x24   :  { %315 = vsyncadd [#allocation4], 4294967264 }
  0x25   :  { %316 = dma.done.wait [#allocation7], 2048  }
  0x26   :  { %317 = vsyncadd [#allocation7], 4294965248  ;;  %v324_v0 = vmov 0.0|0.0   ;;  %v325_v1 = vmov 0.0   ;;  %vm326_vm0 = vmmov 0   ;;  %v59_v2 = vld [vmem:[#allocation6] sm:$0xff] }
  0x27   :  { %216 = vmatprep.subr.bf16.mxu0 %v324_v0  ;;  %50 = vst [vmem:[#allocation2] sm:$0x3] %v325_v1  ;;  %213 = vmatprep.mubr.msk.f32.mxu0 %vm326_vm0, %v325_v1  ;;  %v60_v3 = vld [vmem:[#allocation6 + $0x8] sm:$0xff]  ;;  %v61_v4 = vld [vmem:[#allocation6 + $0x10] sm:$0xff]  ;;  %v62_v6 = vld [vmem:[#allocation6 + $0x18] sm:$0xff]  ;;  %s327_s1 = smov [#allocation8]  }
  0x28   :  { %v217_v5 = vpack.c.bf16 %v60_v3, %v59_v2  ;;  %v220_v7 = vpack.c.bf16 %v62_v6, %v61_v4  ;;  %v63_v8 = vld [vmem:[#allocation6 + $0x20] sm:$0xff]  ;;  %v64_v9 = vld [vmem:[#allocation6 + $0x28] sm:$0xff]  ;;  %v51_v10 = vld [vmem:[#allocation3] sm:$0x3]  ;;  %s152_s6 = sshll.u32 %s327_s1, 4  ;;  %s153_s6 = int_to_ptr.vmem [resolvable:$true] %s152_s6 }
  0x29   :  { %v223_v13 = vpack.c.bf16 %v64_v9, %v63_v8  ;;  %v65_v14 = vld [vmem:[#allocation6 + $0x30] sm:$0xff]  ;;  %v66_v15 = vld [vmem:[#allocation6 + $0x38] sm:$0xff]  ;;  %v67_v17 = vld [vmem:[#allocation6 + $0x40] sm:$0xff]  ;;  %s292_s7 = scalar_lea.vmem %s153_s6, 32  ;;  %p297_p3 = scmp.lt.s32.totalorder %s153_s6, %s153_s6 }
  0x2a   :  { %218 = vmatpush3.bf16.msra.mxu0 %v217_v5  ;;  %v226_v16 = vpack.c.bf16 %v66_v15, %v65_v14  ;;  %v68_v18 = vld [vmem:[#allocation6 + $0x48] sm:$0xff]  ;;  %v69_v20 = vld [vmem:[#allocation6 + $0x50] sm:$0xff]  ;;  %v70_v21 = vld [vmem:[#allocation6 + $0x58] sm:$0xff]  ;;  %p293_p2 = scmp.ne.s32.totalorder %s153_s6, %s292_s7  ;;  %p298_p4 = scmp.lt.s32.totalorder %s292_s7, %s292_s7 }
  0x2b   :  { %219 = vmatprep.subr.bf16.mxu0 %v324_v0  ;;  %v229_v19 = vpack.c.bf16 %v68_v18, %v67_v17  ;;  %v232_v22 = vpack.c.bf16 %v70_v21, %v69_v20  ;;  %v71_v23 = vld [vmem:[#allocation6 + $0x60] sm:$0xff]  ;;  %v72_v24 = vld [vmem:[#allocation6 + $0x68] sm:$0xff]  ;;  %v73_v26 = vld [vmem:[#allocation6 + $0x70] sm:$0xff] }
  0x2c   :  { %v235_v25 = vpack.c.bf16 %v72_v24, %v71_v23  ;;  %v74_v27 = vld [vmem:[#allocation6 + $0x78] sm:$0xff]  ;;  %p299_p5 = por %p298_p4, %p297_p3 }
  0x2d   :  { %v238_v28 = vpack.c.bf16 %v74_v27, %v73_v26 }
  0x2e   :  { %v52_v11 = vld [vmem:[#allocation2] sm:$0x3]  ;;  %221 = vmatpush3.bf16.msra.mxu0 %v220_v7  ;;  %p300_p6 = pnand %p299_p5, %p293_p2 }
  0x2f   :  { %v53_v12 = vadd.f32 %v52_v11, %v51_v10  ;;  %222 = vmatprep.subr.bf16.mxu0 %v324_v0 }
  0x31   :  { %54 = vst [vmem:[#allocation2] sm:$0x3] %v53_v12 }
  0x32   :  { %224 = vmatpush3.bf16.msra.mxu0 %v223_v13 }
  0x33   :  { %225 = vmatprep.subr.bf16.mxu0 %v324_v0 }
  0x36   :  { %227 = vmatpush3.bf16.msra.mxu0 %v226_v16 }
  0x37   :  { %228 = vmatprep.subr.bf16.mxu0 %v324_v0 }
  0x38   :  { %v58_v29 = vld [vmem:[#allocation2] sm:$0x3] }
  0x3a   :  { %230 = vmatpush3.bf16.msra.mxu0 %v229_v19 }
  0x3b   :  { %231 = vmatprep.subr.bf16.mxu0 %v324_v0 }
  0x3e   :  { %233 = vmatpush3.bf16.msra.mxu0 %v232_v22 }
  0x3f   :  { %234 = vmatprep.subr.bf16.mxu0 %v324_v0 }
  0x42   :  { %236 = vmatpush3.bf16.msra.mxu0 %v235_v25 }
  0x43   :  { %237 = vmatprep.subr.bf16.mxu0 %v324_v0 }
  0x46   :  { %239 = vmatpush3.bf16.msra.mxu0 %v238_v28 }
  0x49   :  { %214 = vmatmul.mubr.f32.vlgmr.msra.gmra.mrb[0].mxu0 %v58_v29 }
 0x11c   :  { %v141_v30 = vpop.f32.mrb[0].mxu0 }
 0x11d   :  { %145 = vst [vmem:[#allocation8] sm:$0x3] %v141_v30  ;;  %v215_v31 = vpop.f32.mrb[1].mxu0 }
 0x11e   :  { %303 = shalt.err (!%p300_p6)
}
 0x11f   :  { %s304_s10 = scalar_lea.hbm %s388_s2, 32 }
 0x120   :  { %p305_p7 = scmp.ne.s32.totalorder %s388_s2, %s304_s10  ;;  %p308_p8 = scmp.lt.u32.totalorder %s304_s10, %s388_s2 }
 0x122   :  { %p310_p9 = pnand %p308_p8, %p305_p7 }
 0x124   :  { %313 = shalt.err (!%p310_p9)
}
 0x125   :  { %155 = dma.vmem_to_hbm [thread:$0]  %s153_s6, 32, %s388_s2, [#allocation5]  }
 0x126   :  { %318 = dma.done.wait [#allocation5], 32  }
 0x127   :  { %319 = vsyncadd [#allocation5], 4294967264 }
 0x128   :  { %159 = vsyncpa [#allocation4], 1 }
 0x129   :  { %160 = vsyncpa [#allocation7], 1 }
 0x12a   :  { %161 = vsyncpa [#allocation5], 1 }

</bundles_post_ra>
